<compile_context>
chip_gen: v6e
topology: v6e:2x2x1
jax: 0.10.0
libtpu: 0.0.40
codegen_flags: <defaults>
</compile_context>

<pallas_src>
import jax
import jax.numpy as jnp
from jax.experimental import pallas as pl
from jax.experimental.pallas import tpu as pltpu


def _round_up(n: int, m: int) -> int:
    return (n + m - 1) // m * m


def _q_kernel(x_ref, a_ref, w1x_ref, w1a_ref, b1_ref, w2_ref, b2_ref,
              w3_ref, b3_ref, out_ref):
    # Layer 1: relu(concat([x, a]) @ W1 + b1) == relu(x @ W1x + a @ W1a + b1)
    h1 = jnp.dot(x_ref[...], w1x_ref[...], preferred_element_type=jnp.float32)
    h1 = h1 + jnp.dot(a_ref[...], w1a_ref[...], preferred_element_type=jnp.float32)
    h1 = jnp.maximum(h1 + b1_ref[...], 0.0)

    # Layer 2: relu(h1 @ W2 + b2)
    h2 = jnp.dot(h1, w2_ref[...], preferred_element_type=jnp.float32) + b2_ref[...]
    h2 = jnp.maximum(h2, 0.0)

    # Final fc (out_features == 1): VPU multiply + lane reduce instead of an
    # N=1 MXU matmul. w3_ref is the weight row with shape (1, hdim);
    # b3_ref is an SMEM scalar.
    q = jnp.sum(h2 * w3_ref[...], axis=-1, keepdims=True) + b3_ref[0]
    out_ref[...] = q.astype(out_ref.dtype)


def continuous_mean_q_forward(x, action, params, *, max_tile_b: int = 512):
    """Pallas forward pass of ContinuousMeanQFunction.

    x:      (B, obs_dim)      float32
    action: (B, action_size)  float32
    returns (B, 1)            float32
    """
    w1, b1, w2, b2, w3, b3 = params
    x = x.astype(jnp.float32)
    action = action.astype(jnp.float32)

    B, obs_dim = x.shape
    act_dim = action.shape[1]
    hdim = w1.shape[1]

    # Weight-only preprocessing (tiny, not batch-proportional): split W1 so the
    # concat never materializes, present W3 as a lane row, b3 as a scalar.
    w1x = w1[:obs_dim]
    w1a = w1[obs_dim:]
    w3_row = w3.reshape(1, hdim)
    b3_s = b3.reshape(1)

    # Batch tiling (pad tail tile with zeros; rows are independent).
    tile_b = min(max_tile_b, _round_up(B, 8))
    b_pad = _round_up(B, tile_b)
    if b_pad != B:
        x = jnp.pad(x, ((0, b_pad - B), (0, 0)))
        action = jnp.pad(action, ((0, b_pad - B), (0, 0)))

    grid = (pl.cdiv(b_pad, tile_b),)

    flops = 2 * b_pad * (obs_dim * hdim + act_dim * hdim + hdim * hdim + hdim)
    bytes_accessed = 4 * (
        b_pad * (obs_dim + act_dim + 1)                       # activations in/out
        + (obs_dim + act_dim) * hdim + hdim * hdim            # W1, W2
        + 3 * hdim + 1                                        # b1, b2, w3, b3
    )

    def batch_spec(cols):
        return pl.BlockSpec((tile_b, cols), lambda i: (i, 0))

    def const_spec(shape):
        nd = len(shape)
        return pl.BlockSpec(shape, lambda i, _n=nd: (0,) * _n)

    out = pl.pallas_call(
        _q_kernel,
        out_shape=jax.ShapeDtypeStruct((b_pad, 1), jnp.float32),
        grid=grid,
        in_specs=[
            batch_spec(obs_dim),                 # x tile
            batch_spec(act_dim),                 # action tile
            const_spec((obs_dim, hdim)),         # W1x (resident)
            const_spec((act_dim, hdim)),         # W1a (resident)
            const_spec((1, hdim)),               # b1
            const_spec((hdim, hdim)),            # W2 (resident)
            const_spec((1, hdim)),               # b2
            const_spec((1, hdim)),               # W3 as a row
            pl.BlockSpec(memory_space=pltpu.MemorySpace.SMEM),  # b3 scalar
        ],
        out_specs=pl.BlockSpec((tile_b, 1), lambda i: (i, 0)),
        compiler_params=pltpu.CompilerParams(
            dimension_semantics=("parallel",)),
        cost_estimate=pl.CostEstimate(
            flops=flops, transcendentals=0, bytes_accessed=bytes_accessed),
    )(x, action, w1x, w1a, b1, w2, b2, w3_row, b3_s)

    return out[:B]


def init_params(key, obs_dim, action_size, hidden):
    """Deterministic PyTorch-Linear-style init (uniform +/- 1/sqrt(fan_in))."""
    d_in = obs_dim + action_size
    ks = jax.random.split(key, 6)

    def lin(kw, kb, fan_in, fan_out):
        bound = 1.0 / (fan_in ** 0.5)
        w = jax.random.uniform(kw, (fan_in, fan_out), jnp.float32, -bound, bound)
        b = jax.random.uniform(kb, (1, fan_out), jnp.float32, -bound, bound)
        return w, b

    w1, b1 = lin(ks[0], ks[1], d_in, hidden)      # encoder layer 1
    w2, b2 = lin(ks[2], ks[3], hidden, hidden)    # encoder layer 2
    w3, b3 = lin(ks[4], ks[5], hidden, 1)         # self._fc
    return (w1, b1, w2, b2, w3, b3)


def reference_forward(x, action, params):
    w1, b1, w2, b2, w3, b3 = params
    h = jnp.concatenate([x, action], axis=-1)
    h1 = jnp.maximum(h @ w1 + b1, 0.0)
    h2 = jnp.maximum(h1 @ w2 + b2, 0.0)
    return h2 @ w3 + b3


if __name__ == "__main__":
    B, OBS_DIM, ACTION_SIZE, HIDDEN = 8, 16, 4, 128

    key = jax.random.PRNGKey(0)
    k_x, k_a, k_p = jax.random.split(key, 3)

    x = jax.random.normal(k_x, (B, OBS_DIM), jnp.float32)
    action = jax.random.normal(k_a, (B, ACTION_SIZE), jnp.float32)
    params = init_params(k_p, OBS_DIM, ACTION_SIZE, HIDDEN)

    q = continuous_mean_q_forward(x, action, params)
    q = jax.block_until_ready(q)

    q_ref = reference_forward(x, action, params)
    assert q.shape == (B, 1)
    assert jnp.allclose(q, q_ref, atol=1e-5, rtol=1e-5)

    print("KERNEL_OK")
</pallas_src>

<mosaic_0001>
module attributes {stable_mosaic.version = 11 : i64} {
  func.func @_q_kernel(%arg0: i32, %arg1: memref<8x16xf32, #tpu.memory_space<vmem>>, %arg2: memref<8x4xf32, #tpu.memory_space<vmem>>, %arg3: memref<16x128xf32, #tpu.memory_space<vmem>>, %arg4: memref<4x128xf32, #tpu.memory_space<vmem>>, %arg5: memref<1x128xf32, #tpu.memory_space<vmem>>, %arg6: memref<128x128xf32, #tpu.memory_space<vmem>>, %arg7: memref<1x128xf32, #tpu.memory_space<vmem>>, %arg8: memref<1x128xf32, #tpu.memory_space<vmem>>, %arg9: memref<1xf32, #tpu.memory_space<smem>>, %arg10: memref<8x1xf32, #tpu.memory_space<vmem>>) attributes {dimension_semantics = [#tpu.dimension_semantics<parallel>], iteration_bounds = array<i64: 1>, scalar_prefetch = 0 : i64, scratch_operands = 0 : i64, tpu.core_type = #tpu.core_type<tc>, window_params = [{transform_indices = @transform_0, window_bounds = array<i64: 8, 16>}, {transform_indices = @transform_1, window_bounds = array<i64: 8, 4>}, {pipeline_mode = #tpu.pipeline_mode<synchronous>, transform_indices = @transform_2, window_bounds = array<i64: 16, 128>}, {pipeline_mode = #tpu.pipeline_mode<synchronous>, transform_indices = @transform_3, window_bounds = array<i64: 4, 128>}, {pipeline_mode = #tpu.pipeline_mode<synchronous>, transform_indices = @transform_4, window_bounds = array<i64: 1, 128>}, {pipeline_mode = #tpu.pipeline_mode<synchronous>, transform_indices = @transform_5, window_bounds = array<i64: 128, 128>}, {pipeline_mode = #tpu.pipeline_mode<synchronous>, transform_indices = @transform_6, window_bounds = array<i64: 1, 128>}, {pipeline_mode = #tpu.pipeline_mode<synchronous>, transform_indices = @transform_7, window_bounds = array<i64: 1, 128>}, {transform_indices = @transform_8, window_bounds = array<i64: 1>}, {transform_indices = @transform_9, window_bounds = array<i64: 8, 1>}]} {
    %c0 = arith.constant 0 : index
    %c0_0 = arith.constant 0 : index
    %0 = vector.load %arg1[%c0, %c0_0] : memref<8x16xf32, #tpu.memory_space<vmem>>, vector<8x16xf32>
    %c0_1 = arith.constant 0 : index
    %c0_2 = arith.constant 0 : index
    %1 = vector.load %arg3[%c0_1, %c0_2] : memref<16x128xf32, #tpu.memory_space<vmem>>, vector<16x128xf32>
    %cst = arith.constant dense<0.000000e+00> : vector<8x128xf32>
    %2 = tpu.matmul %0, %1, %cst {dimension_numbers = #tpu.dot_dimension_numbers<[1], [0], [0], [1], [0, 0, 1, 1], [], []>} : vector<8x16xf32>, vector<16x128xf32>, vector<8x128xf32> -> vector<8x128xf32>
    %c0_3 = arith.constant 0 : index
    %c0_4 = arith.constant 0 : index
    %3 = vector.load %arg2[%c0_3, %c0_4] : memref<8x4xf32, #tpu.memory_space<vmem>>, vector<8x4xf32>
    %c0_5 = arith.constant 0 : index
    %c0_6 = arith.constant 0 : index
    %4 = vector.load %arg4[%c0_5, %c0_6] : memref<4x128xf32, #tpu.memory_space<vmem>>, vector<4x128xf32>
    %cst_7 = arith.constant dense<0.000000e+00> : vector<8x128xf32>
    %5 = tpu.matmul %3, %4, %cst_7 {dimension_numbers = #tpu.dot_dimension_numbers<[1], [0], [0], [1], [0, 0, 1, 1], [], []>} : vector<8x4xf32>, vector<4x128xf32>, vector<8x128xf32> -> vector<8x128xf32>
    %6 = arith.addf %2, %5 : vector<8x128xf32>
    %c0_8 = arith.constant 0 : index
    %c0_9 = arith.constant 0 : index
    %7 = vector.load %arg5[%c0_8, %c0_9] : memref<1x128xf32, #tpu.memory_space<vmem>>, vector<1x128xf32>
    %8 = vector.broadcast %7 : vector<1x128xf32> to vector<8x128xf32>
    %9 = arith.addf %6, %8 : vector<8x128xf32>
    %cst_10 = arith.constant 0.000000e+00 : f32
    %10 = vector.broadcast %cst_10 : f32 to vector<8x128xf32>
    %11 = arith.maximumf %9, %10 : vector<8x128xf32>
    %c0_11 = arith.constant 0 : index
    %c0_12 = arith.constant 0 : index
    %12 = vector.load %arg6[%c0_11, %c0_12] : memref<128x128xf32, #tpu.memory_space<vmem>>, vector<128x128xf32>
    %cst_13 = arith.constant dense<0.000000e+00> : vector<8x128xf32>
    %13 = tpu.matmul %11, %12, %cst_13 {dimension_numbers = #tpu.dot_dimension_numbers<[1], [0], [0], [1], [0, 0, 1, 1], [], []>} : vector<8x128xf32>, vector<128x128xf32>, vector<8x128xf32> -> vector<8x128xf32>
    %c0_14 = arith.constant 0 : index
    %c0_15 = arith.constant 0 : index
    %14 = vector.load %arg7[%c0_14, %c0_15] : memref<1x128xf32, #tpu.memory_space<vmem>>, vector<1x128xf32>
    %15 = vector.broadcast %14 : vector<1x128xf32> to vector<8x128xf32>
    %16 = arith.addf %13, %15 : vector<8x128xf32>
    %cst_16 = arith.constant 0.000000e+00 : f32
    %17 = vector.broadcast %cst_16 : f32 to vector<8x128xf32>
    %18 = arith.maximumf %16, %17 : vector<8x128xf32>
    %c0_17 = arith.constant 0 : index
    %c0_18 = arith.constant 0 : index
    %19 = vector.load %arg8[%c0_17, %c0_18] : memref<1x128xf32, #tpu.memory_space<vmem>>, vector<1x128xf32>
    %20 = vector.broadcast %19 : vector<1x128xf32> to vector<8x128xf32>
    %21 = arith.mulf %18, %20 : vector<8x128xf32>
    %cst_19 = arith.constant dense<0.000000e+00> : vector<8xf32>
    %22 = vector.multi_reduction <add>, %21, %cst_19 [1] : vector<8x128xf32> to vector<8xf32>
    %23 = vector.shape_cast %22 : vector<8xf32> to vector<8x1xf32>
    %c0_20 = arith.constant 0 : index
    %24 = memref.load %arg9[%c0_20] : memref<1xf32, #tpu.memory_space<smem>>
    %25 = vector.broadcast %24 : f32 to vector<8x1xf32>
    %26 = arith.addf %23, %25 : vector<8x1xf32>
    %c0_21 = arith.constant 0 : index
    %c0_22 = arith.constant 0 : index
    %27 = vector.load %arg10[%c0_21, %c0_22] : memref<8x1xf32, #tpu.memory_space<vmem>>, vector<8x1xf32>
    tpu.vector_store %arg10[%c0_21, %c0_22], %26 {strides = array<i32>} : memref<8x1xf32, #tpu.memory_space<vmem>>, vector<8x1xf32>,
    return
  }
  func.func @transform_0(%arg0: i32) -> (i32, i32) {
    %c0_i32 = arith.constant 0 : i32
    %c0_i32_0 = arith.constant 0 : i32
    return %arg0, %c0_i32 : i32, i32
  }
  func.func @transform_1(%arg0: i32) -> (i32, i32) {
    %c0_i32 = arith.constant 0 : i32
    %c0_i32_0 = arith.constant 0 : i32
    return %arg0, %c0_i32 : i32, i32
  }
  func.func @transform_2(%arg0: i32) -> (i32, i32) {
    %c0_i32 = arith.constant 0 : i32
    %c0_i32_0 = arith.constant 0 : i32
    %c0_i32_1 = arith.constant 0 : i32
    return %c0_i32, %c0_i32_0 : i32, i32
  }
  func.func @transform_3(%arg0: i32) -> (i32, i32) {
    %c0_i32 = arith.constant 0 : i32
    %c0_i32_0 = arith.constant 0 : i32
    %c0_i32_1 = arith.constant 0 : i32
    return %c0_i32, %c0_i32_0 : i32, i32
  }
  func.func @transform_4(%arg0: i32) -> (i32, i32) {
    %c0_i32 = arith.constant 0 : i32
    %c0_i32_0 = arith.constant 0 : i32
    %c0_i32_1 = arith.constant 0 : i32
    return %c0_i32, %c0_i32_0 : i32, i32
  }
  func.func @transform_5(%arg0: i32) -> (i32, i32) {
    %c0_i32 = arith.constant 0 : i32
    %c0_i32_0 = arith.constant 0 : i32
    %c0_i32_1 = arith.constant 0 : i32
    return %c0_i32, %c0_i32_0 : i32, i32
  }
  func.func @transform_6(%arg0: i32) -> (i32, i32) {
    %c0_i32 = arith.constant 0 : i32
    %c0_i32_0 = arith.constant 0 : i32
    %c0_i32_1 = arith.constant 0 : i32
    return %c0_i32, %c0_i32_0 : i32, i32
  }
  func.func @transform_7(%arg0: i32) -> (i32, i32) {
    %c0_i32 = arith.constant 0 : i32
    %c0_i32_0 = arith.constant 0 : i32
    %c0_i32_1 = arith.constant 0 : i32
    return %c0_i32, %c0_i32_0 : i32, i32
  }
  func.func @transform_8(%arg0: i32) -> i32 {
    %c0_i32 = arith.constant 0 : i32
    %c0_i32_0 = arith.constant 0 : i32
    return %c0_i32 : i32
  }
  func.func @transform_9(%arg0: i32) -> (i32, i32) {
    %c0_i32 = arith.constant 0 : i32
    %c0_i32_0 = arith.constant 0 : i32
    return %arg0, %c0_i32 : i32, i32
  }
}

</mosaic_0001>

<bundles_post_ra>
// kernel: tpu_custom_call.1
= control target key start
LH: loop header
LB: loop body
LE: loop exit
PB: predicated region body
PF: predicated region fallthrough
CT: control target
= control target key end

     0   :  { %15 = vsyncpa [#allocation4], 0  ;;  %s609_s0 = inlined_call_operand.hbm [shape: f32[8,16], index: 0, kind: input, shape index: {}]   ;;  %s610_s1 = inlined_call_operand.vmem [shape: f32[8,4], index: 1, kind: input, shape index: {}]   ;;  %s611_s2 = inlined_call_operand.vmem [shape: f32[16,128], index: 2, kind: input, shape index: {}]   ;;  %s612_s3 = inlined_call_operand.hbm [shape: f32[4,128], index: 3, kind: input, shape index: {}]   ;;  %s613_s4 = inlined_call_operand.vmem [shape: f32[1,128], index: 4, kind: input, shape index: {}]   ;;  %s614_s5 = inlined_call_operand.hbm [shape: f32[128,128], index: 5, kind: input, shape index: {}]   ;;  %s615_s6 = inlined_call_operand.vmem [shape: f32[1,128], index: 6, kind: input, shape index: {}]   ;;  %s616_s7 = inlined_call_operand.vmem [shape: f32[1,128], index: 7, kind: input, shape index: {}]   ;;  %s617_s8 = inlined_call_operand.<no memory space> [shape: f32[1], index: 8, kind: input, shape index: {}]   ;;  %s618_s9 = inlined_call_operand.vmem [shape: f32[8,1], index: 9, kind: output, shape index: {}]  }
   0x1   :  { %16 = vsyncpa [#allocation6], 0  ;;  %s497_s30 = smov [#allocation5]   ;;  %s498_s11 = smov [#allocation3]  }
   0x2   :  { %s37_s10 = sshll.u32 %s497_s30, 4  ;;  %s23_s12 = sshll.u32 %s498_s11, 4  ;;  %s38_s10 = int_to_ptr.vmem [resolvable:$true] %s37_s10  ;;  %s24_s12 = int_to_ptr.vmem [resolvable:$true] %s23_s12 }
   0x3   :  { %s441_s13 = scalar_lea.vmem %s38_s10, 64  ;;  %p446_p1 = scmp.lt.s32.totalorder %s38_s10, %s38_s10 }
   0x4   :  { %p442_p0 = scmp.ne.s32.totalorder %s38_s10, %s441_s13  ;;  %p447_p2 = scmp.lt.s32.totalorder %s441_s13, %s441_s13 }
   0x6   :  { %p448_p3 = por %p447_p2, %p446_p1 }
   0x8   :  { %p449_p4 = pnand %p448_p3, %p442_p0 }
   0xa   :  { %452 = shalt.err (!%p449_p4)
}
   0xb   :  { %40 = dma.hbm_to_vmem [thread:$0]  %s612_s3, 64, %s38_s10, [#allocation6]  }
   0xc   :  { %s461_s16 = scalar_lea.vmem %s24_s12, 128  ;;  %p466_p6 = scmp.lt.s32.totalorder %s24_s12, %s24_s12 }
   0xd   :  { %p462_p5 = scmp.ne.s32.totalorder %s24_s12, %s461_s16  ;;  %p467_p7 = scmp.lt.s32.totalorder %s461_s16, %s461_s16 }
   0xf   :  { %p468_p8 = por %p467_p7, %p466_p6 }
  0x11   :  { %p469_p9 = pnand %p468_p8, %p462_p5 }
  0x13   :  { %472 = shalt.err (!%p469_p9)
}
  0x14   :  { %26 = dma.hbm_to_vmem [thread:$0]  %s609_s0, 128, %s24_s12, [#allocation4]  }
  0x15   :  { %s499_s19 = smov [#allocation7]  }
  0x16   :  { %s48_s20 = sshll.u32 %s499_s19, 4  ;;  %s49_s20 = int_to_ptr.vmem [resolvable:$true] %s48_s20 }
  0x17   :  { %s481_s21 = scalar_lea.vmem %s49_s20, 2048  ;;  %p486_p11 = scmp.lt.s32.totalorder %s49_s20, %s49_s20 }
  0x18   :  { %p482_p10 = scmp.ne.s32.totalorder %s49_s20, %s481_s21  ;;  %p487_p12 = scmp.lt.s32.totalorder %s481_s21, %s481_s21 }
  0x1a   :  { %p488_p13 = por %p487_p12, %p486_p11 }
  0x1c   :  { %p489_p0 = pnand %p488_p13, %p482_p10 }
  0x1e   :  { %492 = shalt.err (!%p489_p0)
}
  0x1f   :  { %s500_s3 = smov 128   ;;  %s501_s22 = smov 8  }
  0x20   :  { %54 = dma.hbm_to_vmem [thread:$0]  %s614_s5, 2048, %s49_s20, [#allocation6], %s500_s3, %s500_s3, %s501_s22  }
  0x21   :  { %493 = dma.done.wait [#allocation4], 128  }
  0x22   :  { %494 = vsyncadd [#allocation4], 4294967168 }
  0x23   :  { %495 = dma.done.wait [#allocation6], 2112  }
  0x24   :  { %496 = vsyncadd [#allocation6], 4294965184  ;;  %v502_v0 = vmov 0.0   ;;  %vm503_vm0 = vmmov 0   ;;  %vm79_vm1 = vcmask 1043456   ;;  %vm75_vm2 = vcmask 31744  }
  0x25   :  { %379 = vmatprep.subr.mxu1 %v502_v0  ;;  %381 = vmatprep.mubr.msk.f32.mxu1 %vm503_vm0, %v502_v0  ;;  %v74_v1 = vld [vmem:[#allocation5] sm:$0xf]  ;;  %v73_v2 = vld [vmem:[%s610_s1] sm:$0xff]  ;;  %vm153_vm3 = vcmask 130048   ;;  %v249_v8 = vld [vmem:[#allocation7 + $0x68] sm:$0xff]  ;;  %v341_v37 = vstv %s617_s8  ;;  %vm343_vm4 = vcmask 7168  }
  0x26   :  { %391 = vmatprep.subr.mxu0 %v502_v0  ;;  %423 = vmatprep.mubr.msk.f32.mxu0 %vm503_vm0, %v502_v0  ;;  %v72_v3 = vld [vmem:[%s611_s2 + $0x8] sm:$0xff]  ;;  %v71_v5 = vld [vmem:[%s611_s2] sm:$0xff]  ;;  %v245_v12 = vld [vmem:[#allocation7 + $0x48] sm:$0xff] }
  0x27   :  { %380 = vmatpush3.msk.msra.mxu1 %vm79_vm1, %v74_v1  ;;  %v251_v4 = vld [vmem:[#allocation7 + $0x78] sm:$0xff]  ;;  %v250_v7 = vld [vmem:[#allocation7 + $0x70] sm:$0xff]  ;;  %v248_v9 = vld [vmem:[#allocation7 + $0x60] sm:$0xff] }
  0x28   :  { %382 = vmatmul.mubr.msk.f32.vlgmr.msra.gmra.mxu1 %vm75_vm2, %v73_v2  ;;  %384 = vmatprep.subr.mxu1 %v502_v0  ;;  %v70_v6 = vld [vmem:[#allocation3] sm:$0xff]  ;;  %v244_v13 = vld [vmem:[#allocation7 + $0x40] sm:$0xff]  ;;  %v241_v16 = vld [vmem:[#allocation7 + $0x28] sm:$0xff] }
  0x29   :  { %385 = vmatpush3.msra.mxu1 %v72_v3  ;;  %388 = vmatprep.mubr.msk.f32.mxu1 %vm503_vm0, %v502_v0  ;;  %v247_v10 = vld [vmem:[#allocation7 + $0x58] sm:$0xff]  ;;  %v246_v11 = vld [vmem:[#allocation7 + $0x50] sm:$0xff]  ;;  %v240_v17 = vld [vmem:[#allocation7 + $0x20] sm:$0xff] }
  0x2a   :  { %386 = vmatprep.subr.mxu1 %v502_v0  ;;  %392 = vmatpush3.msra.mxu0 %v251_v4  ;;  %v243_v14 = vld [vmem:[#allocation7 + $0x38] sm:$0xff]  ;;  %v242_v15 = vld [vmem:[#allocation7 + $0x30] sm:$0xff]  ;;  %v237_v20 = vld [vmem:[#allocation7 + $0x8] sm:$0xff] }
  0x2b   :  { %387 = vmatpush3.msra.mxu1 %v71_v5  ;;  %393 = vmatprep.subr.mxu0 %v502_v0  ;;  %v239_v18 = vld [vmem:[#allocation7 + $0x18] sm:$0xff]  ;;  %v238_v19 = vld [vmem:[#allocation7 + $0x10] sm:$0xff]  ;;  %v236_v21 = vld [vmem:[#allocation7] sm:$0xff] }
  0x2c   :  { %389 = vmatmul.mubr.msk.f32.vlgmr.msra.gmra.mxu1 %vm153_vm3, %v70_v6  ;;  %394 = vmatpush3.msra.mxu0 %v250_v7  ;;  %v354_v25 = vld [vmem:[%s613_s4] ss:$0 sm:$0xff] }
  0x2d   :  { %395 = vmatprep.subr.mxu0 %v502_v0  ;;  %v355_v30 = vld [vmem:[%s615_s6] ss:$0 sm:$0xff] }
  0x2e   :  { %396 = vmatpush3.msra.mxu0 %v249_v8  ;;  %v356_v34 = vld [vmem:[%s616_s7] ss:$0 sm:$0xff] }
  0x2f   :  { %397 = vmatprep.subr.mxu0 %v502_v0 }
  0x30   :  { %398 = vmatpush3.msra.mxu0 %v248_v9 }
  0x31   :  { %399 = vmatprep.subr.mxu0 %v502_v0 }
  0x32   :  { %400 = vmatpush3.msra.mxu0 %v247_v10 }
  0x33   :  { %401 = vmatprep.subr.mxu0 %v502_v0 }
  0x34   :  { %402 = vmatpush3.msra.mxu0 %v246_v11 }
  0x35   :  { %403 = vmatprep.subr.mxu0 %v502_v0 }
  0x36   :  { %404 = vmatpush3.msra.mxu0 %v245_v12 }
  0x37   :  { %405 = vmatprep.subr.mxu0 %v502_v0 }
  0x38   :  { %406 = vmatpush3.msra.mxu0 %v244_v13 }
  0x39   :  { %407 = vmatprep.subr.mxu0 %v502_v0 }
  0x3a   :  { %408 = vmatpush3.msra.mxu0 %v243_v14 }
  0x3b   :  { %409 = vmatprep.subr.mxu0 %v502_v0 }
  0x3c   :  { %410 = vmatpush3.msra.mxu0 %v242_v15 }
  0x3d   :  { %411 = vmatprep.subr.mxu0 %v502_v0 }
  0x3e   :  { %412 = vmatpush3.msra.mxu0 %v241_v16 }
  0x3f   :  { %413 = vmatprep.subr.mxu0 %v502_v0 }
  0x40   :  { %414 = vmatpush3.msra.mxu0 %v240_v17 }
  0x41   :  { %415 = vmatprep.subr.mxu0 %v502_v0 }
  0x42   :  { %416 = vmatpush3.msra.mxu0 %v239_v18 }
  0x43   :  { %417 = vmatprep.subr.mxu0 %v502_v0 }
  0x44   :  { %418 = vmatpush3.msra.mxu0 %v238_v19 }
  0x45   :  { %419 = vmatprep.subr.mxu0 %v502_v0 }
  0x46   :  { %420 = vmatpush3.msra.mxu0 %v237_v20 }
  0x47   :  { %421 = vmatprep.subr.mxu0 %v502_v0 }
  0x48   :  { %422 = vmatpush3.msra.mxu0 %v236_v21 }
  0xe8   :  { %v149_v22 = vpop.f32.mrf.mxu1 }
  0xea   :  { %v383_v23 = vpop.f32.mrf.mxu1 }
  0xec   :  { %v223_v24 = vpop.f32.mrf.mxu1 }
  0xed   :  { %v224_v26 = vadd.f32 %v223_v24, %v149_v22 }
  0xee   :  { %v390_v27 = vpop.f32.mrf.mxu1 }
  0xef   :  { %v234_v28 = vadd.f32 %v354_v25, %v224_v26 }
  0xf1   :  { %v235_v29 = vmax.f32 %v234_v28, 0.0 }
  0xf3   :  { %424 = vmatmul.mubr.f32.vlgmr.msra.gmra.mxu0 %v235_v29 }
 0x1b3   :  { %v325_v31 = vpop.f32.mrf.mxu0 }
 0x1b4   :  { %v326_v32 = vadd.f32 %v355_v30, %v325_v31 }
 0x1b5   :  { %v425_v33 = vpop.f32.mrf.mxu0 }
 0x1b6   :  { %v329_v35 = vmax.f32 %v326_v32, 0.0 }
 0x1b8   :  { %v337_v36 = vmul.f32 %v356_v34, %v329_v35 }
 0x1ba   :  { %338 = vadd.xlane.f32.xlu0 %v337_v36 }
 0x243   :  { %v339_v38 = vpop.xlane.xlu0 %338 }
 0x244   :  { %v342_v39 = vadd.f32 %v341_v37, %v339_v38 }
 0x246   :  { %344 = vst.msk [vmem:[%s618_s9] sm:$0xff] %vm343_vm4, %v342_v39 }
 0x247   :  { %349 = vsyncpa [#allocation4], 1 }
 0x248   :  { %350 = vsyncpa [#allocation6], 1 }

</bundles_post_ra>
